<compile_context>
chip_gen: v7x
topology: tpu7x:2x2x1
jax: 0.10.0
libtpu: 0.0.40
codegen_flags: <defaults>
</compile_context>

<pallas_src>
import functools

import jax
import jax.numpy as jnp
from jax.experimental import pallas as pl
from jax.experimental.pallas import tpu as pltpu


def _round_up(x: int, m: int) -> int:
    return ((x + m - 1) // m) * m


def _vmem_capacity_bytes() -> int:
    """Physical VMEM of the current chip; conservative (v7x) fallback."""
    try:
        return int(pltpu.get_tpu_info().vmem_capacity_bytes)
    except Exception:
        return 64 * 1024 * 1024


def _has_multiple_tensorcores() -> bool:
    """Heuristic: v4 megacore / v7x dual-TensorCore chips."""
    try:
        kind = jax.devices()[0].device_kind.lower()
    except Exception:
        return False
    return ("v4" in kind) or ("v7" in kind) or ("7x" in kind)


# ----------------------------- kernels --------------------------------------


def _mlp_kernel_acc(x_ref, w1_ref, b1_ref, w3_ref, b3_ref, o_ref, acc_ref):
    """Fused fc1 -> ReLU -> fc3 with a separate f32 accumulator (non-f32 out)."""
    h_idx = pl.program_id(1)

    @pl.when(h_idx == 0)
    def _():
        acc_ref[...] = jnp.zeros_like(acc_ref)

    # fc1 partial for this hidden tile: (tm, th) in f32 on the MXU.
    h = jnp.dot(x_ref[...], w1_ref[...], preferred_element_type=jnp.float32)
    h = jnp.maximum(h + b1_ref[...], 0.0)  # bias (f32) + ReLU on the VPU

    # fc3 partial: accumulate this hidden tile's contribution.
    acc_ref[...] += jnp.dot(
        h.astype(w3_ref.dtype), w3_ref[...], preferred_element_type=jnp.float32
    )

    @pl.when(h_idx == pl.num_programs(1) - 1)
    def _():
        o_ref[...] = (acc_ref[...] + b3_ref[...]).astype(o_ref.dtype)


def _mlp_kernel_f32out(x_ref, w1_ref, b1_ref, w3_ref, b3_ref, o_ref):
    """Same as above but accumulates directly into the f32 output block
    (its block index is constant across the h axis, so it is VMEM-resident)."""
    h_idx = pl.program_id(1)

    @pl.when(h_idx == 0)
    def _():
        o_ref[...] = jnp.zeros_like(o_ref)

    h = jnp.dot(x_ref[...], w1_ref[...], preferred_element_type=jnp.float32)
    h = jnp.maximum(h + b1_ref[...], 0.0)

    o_ref[...] += jnp.dot(
        h.astype(w3_ref.dtype), w3_ref[...], preferred_element_type=jnp.float32
    )

    @pl.when(h_idx == pl.num_programs(1) - 1)
    def _():
        o_ref[...] += b3_ref[...]


# ----------------------------- wrapper ---------------------------------------


@functools.partial(jax.jit, static_argnames=("tm", "th", "compute_dtype"))
def mlp_forward(x, w1, b1, w3, b3, *, tm=512, th=1024, compute_dtype=None):
    """y = relu(x @ w1.T + b1) @ w3.T + b3   (PyTorch MLP.forward semantics)."""
    B, D_in = x.shape
    H, _ = w1.shape
    D_out, _ = w3.shape
    out_dtype = jnp.dtype(x.dtype)
    cdtype = jnp.dtype(compute_dtype) if compute_dtype is not None else out_dtype
    in_itemsize = cdtype.itemsize
    out_itemsize = out_dtype.itemsize

    # dtype-aware sublane multiple: 8 for 4-byte, 16 for 2-byte, 32 for 1-byte
    sub_m = max(8, 32 // in_itemsize)
    h_full = _round_up(H, 128)
    n_pad = _round_up(D_out, 128)  # lane-dense output, no masked stores

    use_acc = out_dtype != jnp.dtype(jnp.float32)

    # --- generation-aware VMEM budgeting ---
    capacity = _vmem_capacity_bytes()
    vmem_limit = (capacity * 7) // 8   # headroom for Mosaic internal scratch
    vmem_budget = (capacity * 3) // 4  # target for this kernel's own buffers

    def vmem_bytes(tm_, th_):
        bufs = 2 * (tm_ * D_in + D_in * th_ + th_ * n_pad) * in_itemsize  # x, w1, w3 (double-buffered)
        bufs += 2 * (th_ + n_pad) * 4                                      # biases (f32)
        bufs += 2 * tm_ * n_pad * out_itemsize                             # output
        if use_acc:
            bufs += tm_ * n_pad * 4                                        # f32 accumulator
        return bufs

    # --- tile selection ---
    tm = _round_up(min(tm, _round_up(B, sub_m)), sub_m)

    # v7x / megacore: make sure the "parallel" batch axis has >= 2 programs.
    if (
        _has_multiple_tensorcores()
        and _round_up(B, sub_m) >= 2 * sub_m
        and _round_up(B, tm) // tm < 2
    ):
        tm = _round_up(max(sub_m, tm // 2), sub_m)

    if vmem_bytes(tm, h_full) <= vmem_budget:
        # Whole (padded) weight set fits: collapse the reduction grid to 1 step;
        # weights become grid-resident (not re-streamed per h step).
        th = h_full
    else:
        th = min(_round_up(th, 128), h_full)
        while th > 128 and vmem_bytes(tm, th) > vmem_budget:
            th = _round_up(max(128, th // 2), 128)
        while tm > sub_m and vmem_bytes(tm, th) > vmem_budget:
            tm = _round_up(max(sub_m, tm // 2), sub_m)
        # TODO(synk): for transformer-scale D_out the (tm, n_pad) blocks may still
        # exceed the budget; that regime needs an extra output-column grid axis.

    m_pad = _round_up(B, tm)
    h_pad = _round_up(H, th)

    # --- one-time wrapper-level transpose + zero padding (numerically exact) ---
    x_p = jnp.pad(x, ((0, m_pad - B), (0, 0))).astype(cdtype)                  # (M, D_in)
    w1_t = jnp.pad(w1.T, ((0, 0), (0, h_pad - H))).astype(cdtype)              # (D_in, H)
    w3_t = jnp.pad(w3.T, ((0, h_pad - H), (0, n_pad - D_out))).astype(cdtype)  # (H, N)
    b1_p = jnp.pad(b1, (0, h_pad - H)).reshape(1, h_pad).astype(jnp.float32)   # (1, H)
    b3_p = jnp.pad(b3, (0, n_pad - D_out)).reshape(1, n_pad).astype(jnp.float32)  # (1, N)

    grid = (m_pad // tm, h_pad // th)
    m_tiles = grid[0]

    # Accurate cost hint: x read once, weights/biases re-streamed once per m tile.
    flops = 2 * m_pad * D_in * h_pad + 2 * m_pad * h_pad * n_pad
    bytes_accessed = (
        x_p.size * in_itemsize
        + m_tiles * (w1_t.size + w3_t.size) * in_itemsize
        + m_tiles * (b1_p.size + b3_p.size) * 4
        + m_pad * n_pad * out_itemsize
    )

    if use_acc:
        kernel = _mlp_kernel_acc
        scratch_shapes = [pltpu.VMEM((tm, n_pad), jnp.float32)]
    else:
        kernel = _mlp_kernel_f32out
        scratch_shapes = []

    out = pl.pallas_call(
        kernel,
        out_shape=jax.ShapeDtypeStruct((m_pad, n_pad), out_dtype),
        grid_spec=pltpu.PrefetchScalarGridSpec(
            num_scalar_prefetch=0,
            grid=grid,
            in_specs=[
                pl.BlockSpec((tm, D_in), lambda i, h: (i, 0)),    # x tile
                pl.BlockSpec((D_in, th), lambda i, h: (0, h)),    # w1^T tile
                pl.BlockSpec((1, th), lambda i, h: (0, h)),       # b1 tile (f32)
                pl.BlockSpec((th, n_pad), lambda i, h: (h, 0)),   # w3^T tile
                pl.BlockSpec((1, n_pad), lambda i, h: (0, 0)),    # b3 (f32)
            ],
            out_specs=pl.BlockSpec((tm, n_pad), lambda i, h: (i, 0)),
            scratch_shapes=scratch_shapes,
        ),
        compiler_params=pltpu.CompilerParams(
            dimension_semantics=("parallel", "arbitrary"),
            vmem_limit_bytes=vmem_limit,
        ),
        cost_estimate=pl.CostEstimate(
            flops=flops, transcendentals=0, bytes_accessed=bytes_accessed
        ),
    )(x_p, w1_t, b1_p, w3_t, b3_p)

    return out[:B, :D_out]


if __name__ == "__main__":
    key = jax.random.PRNGKey(0)
    k_x, k_w1, k_b1, k_w3, k_b3 = jax.random.split(key, 5)

    batch = 8
    input_dim = 32
    hidden = 64
    output_dim = 16

    # Deterministic "PyTorch-like" init: U(-1/sqrt(fan_in), 1/sqrt(fan_in)).
    x = jax.random.normal(k_x, (batch, input_dim), dtype=jnp.float32)

    bound1 = 1.0 / jnp.sqrt(jnp.float32(input_dim))
    w1 = jax.random.uniform(k_w1, (hidden, input_dim), minval=-bound1,
                            maxval=bound1, dtype=jnp.float32)
    b1 = jax.random.uniform(k_b1, (hidden,), minval=-bound1, maxval=bound1,
                            dtype=jnp.float32)

    bound3 = 1.0 / jnp.sqrt(jnp.float32(hidden))
    w3 = jax.random.uniform(k_w3, (output_dim, hidden), minval=-bound3,
                            maxval=bound3, dtype=jnp.float32)
    b3 = jax.random.uniform(k_b3, (output_dim,), minval=-bound3, maxval=bound3,
                            dtype=jnp.float32)

    # NOTE: fc2 exists in the PyTorch module but is unused by MLP.forward,
    # so it is intentionally not part of the fused kernel.

    # Reference (same semantics as the PyTorch forward).
    y_ref = jnp.maximum(x @ w1.T + b1, 0.0) @ w3.T + b3

    # f32 path (exact tolerance).
    y = mlp_forward(x, w1, b1, w3, b3)
    jax.block_until_ready(y)
    assert y.shape == (batch, output_dim)
    assert jnp.allclose(y, y_ref, atol=1e-4, rtol=1e-4)

    # bf16 compute path (f32 biases / accumulation / output) — looser tolerance.
    y_bf16 = mlp_forward(x, w1, b1, w3, b3, compute_dtype=jnp.bfloat16)
    jax.block_until_ready(y_bf16)
    assert y_bf16.shape == (batch, output_dim)
    assert jnp.allclose(y_bf16, y_ref, atol=5e-2, rtol=5e-2)

    print("KERNEL_OK")
</pallas_src>

<mosaic_0001>
module attributes {stable_mosaic.version = 11 : i64} {
  func.func @_mlp_kernel_f32out(%arg0: i32, %arg1: i32, %arg2: memref<8x32xf32, #tpu.memory_space<vmem>>, %arg3: memref<32x128xf32, #tpu.memory_space<vmem>>, %arg4: memref<1x128xf32, #tpu.memory_space<vmem>>, %arg5: memref<128x128xf32, #tpu.memory_space<vmem>>, %arg6: memref<1x128xf32, #tpu.memory_space<vmem>>, %arg7: memref<8x128xf32, #tpu.memory_space<vmem>>) attributes {dimension_semantics = [#tpu.dimension_semantics<parallel>, #tpu.dimension_semantics<arbitrary>], iteration_bounds = array<i64: 1, 1>, scalar_prefetch = 0 : i64, scratch_operands = 0 : i64, tpu.core_type = #tpu.core_type<tc>, window_params = [{transform_indices = @transform_0, window_bounds = array<i64: 8, 32>}, {transform_indices = @transform_1, window_bounds = array<i64: 32, 128>}, {transform_indices = @transform_2, window_bounds = array<i64: 1, 128>}, {transform_indices = @transform_3, window_bounds = array<i64: 128, 128>}, {pipeline_mode = #tpu.pipeline_mode<synchronous>, transform_indices = @transform_4, window_bounds = array<i64: 1, 128>}, {transform_indices = @transform_5, window_bounds = array<i64: 8, 128>}]} {
    %c0_i32 = arith.constant 0 : i32
    %0 = arith.cmpi eq, %arg1, %c0_i32 : i32
    %1 = arith.extui %0 : i1 to i32
    %c0_i32_0 = arith.constant 0 : i32
    %2 = arith.cmpi ne, %1, %c0_i32_0 : i32
    scf.if %2 {
      %cst_16 = arith.constant 0.000000e+00 : f32
      %19 = vector.broadcast %cst_16 : f32 to vector<8x128xf32>
      %c0_17 = arith.constant 0 : index
      %c0_18 = arith.constant 0 : index
      %20 = vector.load %arg7[%c0_17, %c0_18] : memref<8x128xf32, #tpu.memory_space<vmem>>, vector<8x128xf32>
      tpu.vector_store %arg7[%c0_17, %c0_18], %19 {strides = array<i32>} : memref<8x128xf32, #tpu.memory_space<vmem>>, vector<8x128xf32>,
    } else {
    }
    %c0 = arith.constant 0 : index
    %c0_1 = arith.constant 0 : index
    %3 = vector.load %arg2[%c0, %c0_1] : memref<8x32xf32, #tpu.memory_space<vmem>>, vector<8x32xf32>
    %c0_2 = arith.constant 0 : index
    %c0_3 = arith.constant 0 : index
    %4 = vector.load %arg3[%c0_2, %c0_3] : memref<32x128xf32, #tpu.memory_space<vmem>>, vector<32x128xf32>
    %cst = arith.constant dense<0.000000e+00> : vector<8x128xf32>
    %5 = tpu.matmul %3, %4, %cst {dimension_numbers = #tpu.dot_dimension_numbers<[1], [0], [0], [1], [0, 0, 1, 1], [], []>} : vector<8x32xf32>, vector<32x128xf32>, vector<8x128xf32> -> vector<8x128xf32>
    %c0_4 = arith.constant 0 : index
    %c0_5 = arith.constant 0 : index
    %6 = vector.load %arg4[%c0_4, %c0_5] : memref<1x128xf32, #tpu.memory_space<vmem>>, vector<1x128xf32>
    %7 = vector.broadcast %6 : vector<1x128xf32> to vector<8x128xf32>
    %8 = arith.addf %5, %7 : vector<8x128xf32>
    %cst_6 = arith.constant 0.000000e+00 : f32
    %9 = vector.broadcast %cst_6 : f32 to vector<8x128xf32>
    %10 = arith.maximumf %8, %9 : vector<8x128xf32>
    %c0_7 = arith.constant 0 : index
    %c0_8 = arith.constant 0 : index
    %11 = vector.load %arg7[%c0_7, %c0_8] : memref<8x128xf32, #tpu.memory_space<vmem>>, vector<8x128xf32>
    %c0_9 = arith.constant 0 : index
    %c0_10 = arith.constant 0 : index
    %12 = vector.load %arg5[%c0_9, %c0_10] : memref<128x128xf32, #tpu.memory_space<vmem>>, vector<128x128xf32>
    %cst_11 = arith.constant dense<0.000000e+00> : vector<8x128xf32>
    %13 = tpu.matmul %10, %12, %cst_11 {dimension_numbers = #tpu.dot_dimension_numbers<[1], [0], [0], [1], [0, 0, 1, 1], [], []>} : vector<8x128xf32>, vector<128x128xf32>, vector<8x128xf32> -> vector<8x128xf32>
    %14 = arith.addf %11, %13 : vector<8x128xf32>
    %c0_12 = arith.constant 0 : index
    %c0_13 = arith.constant 0 : index
    %15 = vector.load %arg7[%c0_12, %c0_13] : memref<8x128xf32, #tpu.memory_space<vmem>>, vector<8x128xf32>
    tpu.vector_store %arg7[%c0_12, %c0_13], %14 {strides = array<i32>} : memref<8x128xf32, #tpu.memory_space<vmem>>, vector<8x128xf32>,
    %c0_i32_14 = arith.constant 0 : i32
    %16 = arith.cmpi eq, %arg1, %c0_i32_14 : i32
    %17 = arith.extui %16 : i1 to i32
    %c0_i32_15 = arith.constant 0 : i32
    %18 = arith.cmpi ne, %17, %c0_i32_15 : i32
    scf.if %18 {
      %c0_16 = arith.constant 0 : index
      %c0_17 = arith.constant 0 : index
      %19 = vector.load %arg7[%c0_16, %c0_17] : memref<8x128xf32, #tpu.memory_space<vmem>>, vector<8x128xf32>
      %c0_18 = arith.constant 0 : index
      %c0_19 = arith.constant 0 : index
      %20 = vector.load %arg6[%c0_18, %c0_19] : memref<1x128xf32, #tpu.memory_space<vmem>>, vector<1x128xf32>
      %21 = vector.broadcast %20 : vector<1x128xf32> to vector<8x128xf32>
      %22 = arith.addf %19, %21 : vector<8x128xf32>
      %c0_20 = arith.constant 0 : index
      %c0_21 = arith.constant 0 : index
      %23 = vector.load %arg7[%c0_20, %c0_21] : memref<8x128xf32, #tpu.memory_space<vmem>>, vector<8x128xf32>
      tpu.vector_store %arg7[%c0_20, %c0_21], %22 {strides = array<i32>} : memref<8x128xf32, #tpu.memory_space<vmem>>, vector<8x128xf32>,
    } else {
    }
    return
  }
  func.func @transform_0(%arg0: i32, %arg1: i32) -> (i32, i32) {
    %c0_i32 = arith.constant 0 : i32
    %c0_i32_0 = arith.constant 0 : i32
    return %arg0, %c0_i32 : i32, i32
  }
  func.func @transform_1(%arg0: i32, %arg1: i32) -> (i32, i32) {
    %c0_i32 = arith.constant 0 : i32
    %c0_i32_0 = arith.constant 0 : i32
    return %c0_i32, %arg1 : i32, i32
  }
  func.func @transform_2(%arg0: i32, %arg1: i32) -> (i32, i32) {
    %c0_i32 = arith.constant 0 : i32
    %c0_i32_0 = arith.constant 0 : i32
    return %c0_i32, %arg1 : i32, i32
  }
  func.func @transform_3(%arg0: i32, %arg1: i32) -> (i32, i32) {
    %c0_i32 = arith.constant 0 : i32
    %c0_i32_0 = arith.constant 0 : i32
    return %arg1, %c0_i32 : i32, i32
  }
  func.func @transform_4(%arg0: i32, %arg1: i32) -> (i32, i32) {
    %c0_i32 = arith.constant 0 : i32
    %c0_i32_0 = arith.constant 0 : i32
    %c0_i32_1 = arith.constant 0 : i32
    return %c0_i32, %c0_i32_0 : i32, i32
  }
  func.func @transform_5(%arg0: i32, %arg1: i32) -> (i32, i32) {
    %c0_i32 = arith.constant 0 : i32
    %c0_i32_0 = arith.constant 0 : i32
    return %arg0, %c0_i32 : i32, i32
  }
}

</mosaic_0001>

<bundles_post_ra>
// kernel: mlp_forward.1
= control target key start
LH: loop header
LB: loop body
LE: loop exit
PB: predicated region body
PF: predicated region fallthrough
CT: control target
= control target key end

     0   :  { %v358_v3 = vmov 0.0|0.0   ;;  %vm359_vm0 = vmmov 0   ;;  %v360_v6 = vmov 0.0   ;;  %s473_s0 = inlined_call_operand.vmem [shape: f32[8,32], index: 0, kind: input, shape index: {}]   ;;  %s474_s1 = inlined_call_operand.vmem [shape: f32[32,128], index: 1, kind: input, shape index: {}]   ;;  %s475_s2 = inlined_call_operand.vmem [shape: f32[1,128], index: 2, kind: input, shape index: {}]   ;;  %s476_s3 = inlined_call_operand.vmem [shape: f32[128,128], index: 3, kind: input, shape index: {}]   ;;  %s477_s4 = inlined_call_operand.vmem [shape: f32[1,128], index: 4, kind: input, shape index: {}]   ;;  %s478_s5 = inlined_call_operand.hbm [shape: f32[8,128], index: 5, kind: output, shape index: {}]  }
   0x1   :  { %v27_v0 = vld [vmem:[%s474_s1] sm:$0xff]  ;;  %v28_v1 = vld [vmem:[%s474_s1 + $0x8] sm:$0xff]  ;;  %v29_v2 = vld [vmem:[%s474_s1 + $0x10] sm:$0xff]  ;;  %300 = vmatprep.subr.bf16.mxu0 %v358_v3  ;;  %262 = vmatprep.mubr.msk.f32.mxu0 %vm359_vm0, %v360_v6 }
   0x2   :  { %v301_v4 = vpack.c.bf16 %v28_v1, %v27_v0  ;;  %v30_v5 = vld [vmem:[%s474_s1 + $0x18] sm:$0xff]  ;;  %v114_v7 = vld [vmem:[%s476_s3] sm:$0xff]  ;;  %306 = vmatprep.subr.bf16.mxu1 %v358_v3  ;;  %v115_v8 = vld [vmem:[%s476_s3 + $0x8] sm:$0xff]  ;;  %297 = vmatprep.mubr.msk.f32.mxu1 %vm359_vm0, %v360_v6 }
   0x3   :  { %v116_v9 = vld [vmem:[%s476_s3 + $0x10] sm:$0xff]  ;;  %v117_v10 = vld [vmem:[%s476_s3 + $0x18] sm:$0xff]  ;;  %v304_v11 = vpack.c.bf16 %v30_v5, %v29_v2  ;;  %v307_v12 = vpack.c.bf16 %v115_v8, %v114_v7  ;;  %v118_v14 = vld [vmem:[%s476_s3 + $0x20] sm:$0xff] }
   0x4   :  { %302 = vmatpush3.bf16.msra.mxu0 %v301_v4  ;;  %v310_v13 = vpack.c.bf16 %v117_v10, %v116_v9  ;;  %v119_v15 = vld [vmem:[%s476_s3 + $0x28] sm:$0xff] }
   0x5   :  { %303 = vmatprep.subr.bf16.mxu0 %v358_v3  ;;  %308 = vmatpush3.bf16.msra.mxu1 %v307_v12 }
   0x6   :  { %309 = vmatprep.subr.bf16.mxu1 %v358_v3 }
   0x7   :  { %10 = vsyncpa [#allocation3], 0  ;;  %v26_v16 = vld [vmem:[%s473_s0] sm:$0xff]  ;;  %vm38_vm1 = vcmask 261120   ;;  %v313_v17 = vpack.c.bf16 %v119_v15, %v118_v14  ;;  %v120_v18 = vld [vmem:[%s476_s3 + $0x30] sm:$0xff]  ;;  %s361_s11 = smov [#allocation2]  }
   0x8   :  { %305 = vmatpush3.bf16.msra.mxu0 %v304_v11  ;;  %v121_v19 = vld [vmem:[%s476_s3 + $0x38] sm:$0xff]  ;;  %v122_v21 = vld [vmem:[%s476_s3 + $0x40] sm:$0xff]  ;;  %v123_v22 = vld [vmem:[%s476_s3 + $0x48] sm:$0xff]  ;;  %s221_s12 = sshll.u32 %s361_s11, 4  ;;  %s222_s12 = int_to_ptr.vmem [resolvable:$true] %s221_s12 }
   0x9   :  { %311 = vmatpush3.bf16.msra.mxu1 %v310_v13  ;;  %v316_v20 = vpack.c.bf16 %v121_v19, %v120_v18  ;;  %v319_v23 = vpack.c.bf16 %v123_v22, %v122_v21  ;;  %v124_v24 = vld [vmem:[%s476_s3 + $0x50] sm:$0xff]  ;;  %v125_v25 = vld [vmem:[%s476_s3 + $0x58] sm:$0xff]  ;;  %v126_v27 = vld [vmem:[%s476_s3 + $0x60] sm:$0xff]  ;;  %p339_p1 = scmp.lt.s32.totalorder %s222_s12, %s222_s12 }
   0xa   :  { %312 = vmatprep.subr.bf16.mxu1 %v358_v3  ;;  %v322_v26 = vpack.c.bf16 %v125_v25, %v124_v24  ;;  %v127_v28 = vld [vmem:[%s476_s3 + $0x68] sm:$0xff]  ;;  %v128_v30 = vld [vmem:[%s476_s3 + $0x70] sm:$0xff]  ;;  %v129_v31 = vld [vmem:[%s476_s3 + $0x78] sm:$0xff]  ;;  %s334_s3 = scalar_lea.vmem %s222_s12, 128 }
   0xb   :  { %263 = vmatmul.mubr.msk.f32.vlgmr.msra.gmra.mrb[0].mxu0 %vm38_vm1, %v26_v16  ;;  %v325_v29 = vpack.c.bf16 %v127_v28, %v126_v27  ;;  %v328_v32 = vpack.c.bf16 %v129_v31, %v128_v30  ;;  %v229_v33 = vld [vmem:[%s475_s2] ss:$0 sm:$0xff]  ;;  %p335_p0 = scmp.ne.s32.totalorder %s222_s12, %s334_s3  ;;  %p340_p2 = scmp.lt.s32.totalorder %s334_s3, %s334_s3 }
   0xc   :  { %v231_v39 = vld [vmem:[%s477_s4] ss:$0 sm:$0xff] }
   0xd   :  { %314 = vmatpush3.bf16.msra.mxu1 %v313_v17  ;;  %p341_p3 = por %p340_p2, %p339_p1 }
   0xe   :  { %315 = vmatprep.subr.bf16.mxu1 %v358_v3 }
   0xf   :  { %p342_p4 = pnand %p341_p3, %p335_p0 }
  0x11   :  { %317 = vmatpush3.bf16.msra.mxu1 %v316_v20 }
  0x12   :  { %318 = vmatprep.subr.bf16.mxu1 %v358_v3 }
  0x15   :  { %320 = vmatpush3.bf16.msra.mxu1 %v319_v23 }
  0x16   :  { %321 = vmatprep.subr.bf16.mxu1 %v358_v3 }
  0x19   :  { %323 = vmatpush3.bf16.msra.mxu1 %v322_v26 }
  0x1a   :  { %324 = vmatprep.subr.bf16.mxu1 %v358_v3 }
  0x1d   :  { %326 = vmatpush3.bf16.msra.mxu1 %v325_v29 }
  0x1e   :  { %327 = vmatprep.subr.bf16.mxu1 %v358_v3 }
  0x21   :  { %329 = vmatpush3.bf16.msra.mxu1 %v328_v32 }
  0xde   :  { %v108_v34 = vpop.f32.mrb[0].mxu0 }
  0xdf   :  { %v109_v35 = vadd.f32 %v229_v33, %v108_v34  ;;  %v264_v36 = vpop.f32.mrb[1].mxu0 }
  0xe1   :  { %v112_v37 = vmax.f32 %v109_v35, 0.0 }
  0xe3   :  { %298 = vmatmul.mubr.f32.vlgmr.msra.gmra.mrb[0].mxu1 %v112_v37 }
 0x1b6   :  { %v196_v38 = vpop.f32.mrb[0].mxu1 }
 0x1b7   :  { %v299_v40 = vpop.f32.mrb[1].mxu1  ;;  %v213_v41 = vadd.f32 %v231_v39, %v196_v38 }
 0x1b9   :  { %214 = vst [vmem:[#allocation2] sm:$0xff] %v213_v41 }
 0x1ba   :  { %345 = shalt.err (!%p342_p4)
}
 0x1bb   :  { %s346_s14 = scalar_lea.hbm %s478_s5, 128 }
 0x1bc   :  { %p347_p5 = scmp.ne.s32.totalorder %s478_s5, %s346_s14  ;;  %p350_p6 = scmp.lt.u32.totalorder %s346_s14, %s478_s5 }
 0x1be   :  { %p352_p7 = pnand %p350_p6, %p347_p5 }
 0x1c0   :  { %355 = shalt.err (!%p352_p7)
}
 0x1c1   :  { %224 = dma.vmem_to_hbm [thread:$0]  %s222_s12, 128, %s478_s5, [#allocation3]  }
 0x1c2   :  { %356 = dma.done.wait [#allocation3], 128  }
 0x1c3   :  { %357 = vsyncadd [#allocation3], 4294967168 }
 0x1c4   :  { %228 = vsyncpa [#allocation3], 1 }

</bundles_post_ra>
